<compile_context>
chip_gen: v7x
topology: tpu7x:2x2x1
jax: 0.10.0
libtpu: 0.0.40
codegen_flags: <defaults>
</compile_context>

<pallas_src>
import jax
import jax.numpy as jnp
from jax.experimental import pallas as pl
from jax.experimental.pallas import tpu as pltpu

_LANE = 128
_SUBLANE = 8


def _round_up(x, m):
    return (x + m - 1) // m * m


def _pad_to(a, shape):
    pads = [(0, t - s) for s, t in zip(a.shape, shape)]
    return jnp.pad(a, pads)


# ----------------------------------------------------------------------------
# Kernels
# ----------------------------------------------------------------------------
def _fused_eg_kernel(x_ref, ew1_ref, eb1_ref, ew2_ref, eb2_ref,
                     gw1_ref, gb1_ref, gw2_ref, gb2_ref,
                     z_ref, xr_ref):
    """z = E(x); x_rec = G(z), fused. bf16 matmul operands, f32 accumulation."""
    x = x_ref[...].astype(jnp.bfloat16)
    h = jnp.dot(x, ew1_ref[...], preferred_element_type=jnp.float32) + eb1_ref[...]
    h = jnp.maximum(h, 0.0).astype(jnp.bfloat16)
    z = jnp.dot(h, ew2_ref[...], preferred_element_type=jnp.float32) + eb2_ref[...]
    z_ref[...] = z.astype(z_ref.dtype)                      # lane-dense (tb, 128)

    g = jnp.dot(z.astype(jnp.bfloat16), gw1_ref[...],
                preferred_element_type=jnp.float32) + gb1_ref[...]
    g = jnp.maximum(g, 0.0).astype(jnp.bfloat16)
    xr = jnp.dot(g, gw2_ref[...], preferred_element_type=jnp.float32) + gb2_ref[...]
    xr_ref[...] = xr.astype(xr_ref.dtype)


def _mlp2_kernel(x_ref, w1_ref, b1_ref, w2_ref, b2_ref, o_ref):
    """Single 2-layer MLP (used for encode-only / generate-only / sample)."""
    x = x_ref[...].astype(jnp.bfloat16)
    h = jnp.dot(x, w1_ref[...], preferred_element_type=jnp.float32) + b1_ref[...]
    h = jnp.maximum(h, 0.0).astype(jnp.bfloat16)
    out = jnp.dot(h, w2_ref[...], preferred_element_type=jnp.float32) + b2_ref[...]
    o_ref[...] = out.astype(o_ref.dtype)


# ----------------------------------------------------------------------------
# pallas_call wrappers
# ----------------------------------------------------------------------------
def _batch_pad(x):
    """Pad batch to a sublane-aligned tile; returns (x_pad, B_pad, tile_b)."""
    b = x.shape[0]
    if b <= 256:
        bp = max(_SUBLANE, _round_up(b, _SUBLANE))
        tb = bp
    else:
        tb = 256
        bp = _round_up(b, tb)
    if bp != b:
        x = jnp.pad(x, ((0, bp - b), (0, 0)))
    return x, bp, tb


def _batched_spec(tb, d):
    return pl.BlockSpec((tb, d), lambda i: (i, 0))


def _full_spec(a):
    return pl.BlockSpec(a.shape, lambda i: (0, 0))


def _fused_eg(x_pad, bp, tb, e_pad, g_pad, l_pad, d_pad):
    ew1, eb1, ew2, eb2 = e_pad
    gw1, gb1, gw2, gb2 = g_pad
    d_in_pad = x_pad.shape[1]
    z_pad, xr_pad = pl.pallas_call(
        _fused_eg_kernel,
        out_shape=(jax.ShapeDtypeStruct((bp, l_pad), jnp.float32),
                   jax.ShapeDtypeStruct((bp, d_pad), jnp.float32)),
        grid=(bp // tb,),
        in_specs=[_batched_spec(tb, d_in_pad),
                  _full_spec(ew1), _full_spec(eb1),
                  _full_spec(ew2), _full_spec(eb2),
                  _full_spec(gw1), _full_spec(gb1),
                  _full_spec(gw2), _full_spec(gb2)],
        out_specs=(_batched_spec(tb, l_pad), _batched_spec(tb, d_pad)),
        compiler_params=pltpu.CompilerParams(
            dimension_semantics=("parallel",)),
    )(x_pad, ew1, eb1, ew2, eb2, gw1, gb1, gw2, gb2)
    return z_pad, xr_pad


def _mlp2(x_pad, bp, tb, params4, d_out):
    w1, b1, w2, b2 = params4
    d_in_pad = x_pad.shape[1]
    return pl.pallas_call(
        _mlp2_kernel,
        out_shape=jax.ShapeDtypeStruct((bp, d_out), jnp.float32),
        grid=(bp // tb,),
        in_specs=[_batched_spec(tb, d_in_pad),
                  _full_spec(w1), _full_spec(b1),
                  _full_spec(w2), _full_spec(b2)],
        out_specs=_batched_spec(tb, d_out),
        compiler_params=pltpu.CompilerParams(
            dimension_semantics=("parallel",)),
    )(x_pad, w1, b1, w2, b2)


# ----------------------------------------------------------------------------
# Parameter construction (PyTorch-Linear-style uniform init; bf16 weights,
# f32 biases; padded kernel copies with exact zero padding).
# ----------------------------------------------------------------------------
def _linear_params(key, fan_in, fan_out):
    kw, kb = jax.random.split(key)
    bound = 1.0 / (float(fan_in) ** 0.5)
    w = jax.random.uniform(kw, (fan_in, fan_out), jnp.float32, -bound, bound)
    b = jax.random.uniform(kb, (1, fan_out), jnp.float32, -bound, bound)
    return w.astype(jnp.bfloat16), b


def make_alphagan_params(key, img_shape=(4, 16, 16), latent_dim=8, hidden=32):
    C, H, W = img_shape
    d_in = C * H * W
    d_pad = _round_up(d_in, _LANE)
    h_pad = _round_up(hidden, _LANE)
    l_pad = _round_up(latent_dim, _LANE)

    k = jax.random.split(key, 4)
    e_w1, e_b1 = _linear_params(k[0], d_in, hidden)      # E: d_in -> hidden
    e_w2, e_b2 = _linear_params(k[1], hidden, latent_dim)  # E: hidden -> latent
    g_w1, g_b1 = _linear_params(k[2], latent_dim, hidden)  # G: latent -> hidden
    g_w2, g_b2 = _linear_params(k[3], hidden, d_in)      # G: hidden -> d_in

    e_pad = (_pad_to(e_w1, (d_pad, h_pad)), _pad_to(e_b1, (1, h_pad)),
             _pad_to(e_w2, (h_pad, l_pad)), _pad_to(e_b2, (1, l_pad)))
    g_pad = (_pad_to(g_w1, (l_pad, h_pad)), _pad_to(g_b1, (1, h_pad)),
             _pad_to(g_w2, (h_pad, d_pad)), _pad_to(g_b2, (1, d_pad)))

    return dict(
        img_shape=img_shape, latent_dim=latent_dim, hidden=hidden,
        d_in_pad=d_pad, hidden_pad=h_pad, latent_pad=l_pad,
        E=(e_w1, e_b1, e_w2, e_b2), G=(g_w1, g_b1, g_w2, g_b2),
        E_pad=e_pad, G_pad=g_pad)


# ----------------------------------------------------------------------------
# AlphaGAN.forward
#   mode=None         : z = E(x), x_rec = G(z)        -> (z, x_rec)   [fused]
#   mode='encode'     : z = E(x)                      -> z
#   mode='generate'   : x = G(z)                      -> x
#   mode='sample'     : z ~ N(0, I), x = G(z)         -> (z, x)
#   mode='reconstruct': G(E(x))                       -> x_rec        [fused]
# ----------------------------------------------------------------------------
def alphagan_forward(params, arg, mode=None, rng=None):
    C, H, W = params["img_shape"]
    d_in = C * H * W
    latent = params["latent_dim"]
    d_pad = params["d_in_pad"]
    l_pad = params["latent_pad"]
    e_pad = params["E_pad"]
    g_pad = params["G_pad"]

    def _prep_x(x_nchw):
        b = x_nchw.shape[0]
        xf = x_nchw.reshape(b, d_in).astype(jnp.float32)
        if d_pad != d_in:
            xf = jnp.pad(xf, ((0, 0), (0, d_pad - d_in)))
        xp, bp, tb = _batch_pad(xf)
        return xp, b, bp, tb

    def _prep_z(z):
        b = z.shape[0]
        zf = z.astype(jnp.float32)
        if l_pad != latent:
            zf = jnp.pad(zf, ((0, 0), (0, l_pad - latent)))
        zp, bp, tb = _batch_pad(zf)
        return zp, b, bp, tb

    def _generate_from(z):
        zp, b, bp, tb = _prep_z(z)
        xr = _mlp2(zp, bp, tb, g_pad, d_pad)
        return xr[:b, :d_in].reshape(b, C, H, W)

    if mode == "sample":
        n = int(arg)
        assert rng is not None
        z = jax.random.normal(rng, (n, latent), jnp.float32)
        return z, _generate_from(z)
    if mode == "generate":
        return _generate_from(arg)

    xp, b, bp, tb = _prep_x(arg)
    if mode == "encode":
        return _mlp2(xp, bp, tb, e_pad, l_pad)[:b, :latent]

    z_p, xr_p = _fused_eg(xp, bp, tb, e_pad, g_pad, l_pad, d_pad)
    x_rec = xr_p[:b, :d_in].reshape(b, C, H, W)
    if mode == "reconstruct":
        return x_rec
    return z_p[:b, :latent], x_rec


# ----------------------------------------------------------------------------
# Pure-JAX reference (same bf16-stored weights, f32 math) for a sanity check.
# ----------------------------------------------------------------------------
def _ref_forward(params, x):
    C, H, W = params["img_shape"]
    b = x.shape[0]
    e_w1, e_b1, e_w2, e_b2 = params["E"]
    g_w1, g_b1, g_w2, g_b2 = params["G"]
    f32 = jnp.float32
    xf = x.reshape(b, C * H * W).astype(f32)
    z = jnp.maximum(xf @ e_w1.astype(f32) + e_b1, 0.0) @ e_w2.astype(f32) + e_b2
    xr = jnp.maximum(z @ g_w1.astype(f32) + g_b1, 0.0) @ g_w2.astype(f32) + g_b2
    return z, xr.reshape(b, C, H, W)


if __name__ == "__main__":
    key = jax.random.PRNGKey(0)
    k_param, k_x, k_sample = jax.random.split(key, 3)

    params = make_alphagan_params(k_param, img_shape=(4, 16, 16),
                                  latent_dim=8, hidden=32)

    # Small deterministic input batch, NCHW like the PyTorch module.
    x = jax.random.normal(k_x, (2, 4, 16, 16), jnp.float32)

    # Default mode forward: (z, x_rec) via the fused E+G kernel.
    z, x_rec = alphagan_forward(params, x, mode=None)
    z = jax.block_until_ready(z)
    x_rec = jax.block_until_ready(x_rec)

    # Sample mode (z_prior, x_prior), as used inside the losses.
    z_prior, x_prior = alphagan_forward(params, 2, mode="sample", rng=k_sample)
    jax.block_until_ready(x_prior)

    # Other modes exercised once.
    z_enc = alphagan_forward(params, x, mode="encode")
    x_reco = alphagan_forward(params, x, mode="reconstruct")
    jax.block_until_ready(x_reco)

    # Sanity check against pure-JAX reference (bf16 matmul inputs -> loose tol).
    z_ref, x_ref = _ref_forward(params, x)
    assert z.shape == (2, 8) and x_rec.shape == (2, 4, 16, 16)
    assert z_prior.shape == (2, 8) and x_prior.shape == (2, 4, 16, 16)
    assert z_enc.shape == (2, 8) and x_reco.shape == (2, 4, 16, 16)
    assert jnp.allclose(z, z_ref, atol=3e-2, rtol=3e-2)
    assert jnp.allclose(x_rec, x_ref, atol=3e-2, rtol=3e-2)
    assert jnp.allclose(x_reco, x_rec, atol=1e-3, rtol=1e-3)

    print("KERNEL_OK")
</pallas_src>

<mosaic_0001>
module attributes {stable_mosaic.version = 11 : i64} {
  func.func @_fused_eg_kernel(%arg0: i32, %arg1: memref<8x1024xf32, #tpu.memory_space<vmem>>, %arg2: memref<1024x128xbf16, #tpu.memory_space<vmem>>, %arg3: memref<1x128xf32, #tpu.memory_space<vmem>>, %arg4: memref<128x128xbf16, #tpu.memory_space<vmem>>, %arg5: memref<1x128xf32, #tpu.memory_space<vmem>>, %arg6: memref<128x128xbf16, #tpu.memory_space<vmem>>, %arg7: memref<1x128xf32, #tpu.memory_space<vmem>>, %arg8: memref<128x1024xbf16, #tpu.memory_space<vmem>>, %arg9: memref<1x1024xf32, #tpu.memory_space<vmem>>, %arg10: memref<8x128xf32, #tpu.memory_space<vmem>>, %arg11: memref<8x1024xf32, #tpu.memory_space<vmem>>) attributes {dimension_semantics = [#tpu.dimension_semantics<parallel>], iteration_bounds = array<i64: 1>, scalar_prefetch = 0 : i64, scratch_operands = 0 : i64, tpu.core_type = #tpu.core_type<tc>, window_params = [{transform_indices = @transform_0, window_bounds = array<i64: 8, 1024>}, {pipeline_mode = #tpu.pipeline_mode<synchronous>, transform_indices = @transform_1, window_bounds = array<i64: 1024, 128>}, {pipeline_mode = #tpu.pipeline_mode<synchronous>, transform_indices = @transform_2, window_bounds = array<i64: 1, 128>}, {pipeline_mode = #tpu.pipeline_mode<synchronous>, transform_indices = @transform_3, window_bounds = array<i64: 128, 128>}, {pipeline_mode = #tpu.pipeline_mode<synchronous>, transform_indices = @transform_4, window_bounds = array<i64: 1, 128>}, {pipeline_mode = #tpu.pipeline_mode<synchronous>, transform_indices = @transform_5, window_bounds = array<i64: 128, 128>}, {pipeline_mode = #tpu.pipeline_mode<synchronous>, transform_indices = @transform_6, window_bounds = array<i64: 1, 128>}, {pipeline_mode = #tpu.pipeline_mode<synchronous>, transform_indices = @transform_7, window_bounds = array<i64: 128, 1024>}, {pipeline_mode = #tpu.pipeline_mode<synchronous>, transform_indices = @transform_8, window_bounds = array<i64: 1, 1024>}, {transform_indices = @transform_9, window_bounds = array<i64: 8, 128>}, {transform_indices = @transform_10, window_bounds = array<i64: 8, 1024>}]} {
    %c0 = arith.constant 0 : index
    %c0_0 = arith.constant 0 : index
    %0 = vector.load %arg1[%c0, %c0_0] : memref<8x1024xf32, #tpu.memory_space<vmem>>, vector<8x1024xf32>
    %1 = arith.truncf %0 : vector<8x1024xf32> to vector<8x1024xbf16>
    %c0_1 = arith.constant 0 : index
    %c0_2 = arith.constant 0 : index
    %2 = vector.load %arg2[%c0_1, %c0_2] : memref<1024x128xbf16, #tpu.memory_space<vmem>>, vector<1024x128xbf16>
    %cst = arith.constant dense<0.000000e+00> : vector<8x128xf32>
    %3 = tpu.matmul %1, %2, %cst {dimension_numbers = #tpu.dot_dimension_numbers<[1], [0], [0], [1], [0, 0, 1, 1], [], []>} : vector<8x1024xbf16>, vector<1024x128xbf16>, vector<8x128xf32> -> vector<8x128xf32>
    %c0_3 = arith.constant 0 : index
    %c0_4 = arith.constant 0 : index
    %4 = vector.load %arg3[%c0_3, %c0_4] : memref<1x128xf32, #tpu.memory_space<vmem>>, vector<1x128xf32>
    %5 = vector.broadcast %4 : vector<1x128xf32> to vector<8x128xf32>
    %6 = arith.addf %3, %5 : vector<8x128xf32>
    %cst_5 = arith.constant 0.000000e+00 : f32
    %7 = vector.broadcast %cst_5 : f32 to vector<8x128xf32>
    %8 = arith.maximumf %6, %7 : vector<8x128xf32>
    %9 = arith.truncf %8 : vector<8x128xf32> to vector<8x128xbf16>
    %c0_6 = arith.constant 0 : index
    %c0_7 = arith.constant 0 : index
    %10 = vector.load %arg4[%c0_6, %c0_7] : memref<128x128xbf16, #tpu.memory_space<vmem>>, vector<128x128xbf16>
    %cst_8 = arith.constant dense<0.000000e+00> : vector<8x128xf32>
    %11 = tpu.matmul %9, %10, %cst_8 {dimension_numbers = #tpu.dot_dimension_numbers<[1], [0], [0], [1], [0, 0, 1, 1], [], []>} : vector<8x128xbf16>, vector<128x128xbf16>, vector<8x128xf32> -> vector<8x128xf32>
    %c0_9 = arith.constant 0 : index
    %c0_10 = arith.constant 0 : index
    %12 = vector.load %arg5[%c0_9, %c0_10] : memref<1x128xf32, #tpu.memory_space<vmem>>, vector<1x128xf32>
    %13 = vector.broadcast %12 : vector<1x128xf32> to vector<8x128xf32>
    %14 = arith.addf %11, %13 : vector<8x128xf32>
    %c0_11 = arith.constant 0 : index
    %c0_12 = arith.constant 0 : index
    %15 = vector.load %arg10[%c0_11, %c0_12] : memref<8x128xf32, #tpu.memory_space<vmem>>, vector<8x128xf32>
    tpu.vector_store %arg10[%c0_11, %c0_12], %14 {strides = array<i32>} : memref<8x128xf32, #tpu.memory_space<vmem>>, vector<8x128xf32>,
    %16 = arith.truncf %14 : vector<8x128xf32> to vector<8x128xbf16>
    %c0_13 = arith.constant 0 : index
    %c0_14 = arith.constant 0 : index
    %17 = vector.load %arg6[%c0_13, %c0_14] : memref<128x128xbf16, #tpu.memory_space<vmem>>, vector<128x128xbf16>
    %cst_15 = arith.constant dense<0.000000e+00> : vector<8x128xf32>
    %18 = tpu.matmul %16, %17, %cst_15 {dimension_numbers = #tpu.dot_dimension_numbers<[1], [0], [0], [1], [0, 0, 1, 1], [], []>} : vector<8x128xbf16>, vector<128x128xbf16>, vector<8x128xf32> -> vector<8x128xf32>
    %c0_16 = arith.constant 0 : index
    %c0_17 = arith.constant 0 : index
    %19 = vector.load %arg7[%c0_16, %c0_17] : memref<1x128xf32, #tpu.memory_space<vmem>>, vector<1x128xf32>
    %20 = vector.broadcast %19 : vector<1x128xf32> to vector<8x128xf32>
    %21 = arith.addf %18, %20 : vector<8x128xf32>
    %cst_18 = arith.constant 0.000000e+00 : f32
    %22 = vector.broadcast %cst_18 : f32 to vector<8x128xf32>
    %23 = arith.maximumf %21, %22 : vector<8x128xf32>
    %24 = arith.truncf %23 : vector<8x128xf32> to vector<8x128xbf16>
    %c0_19 = arith.constant 0 : index
    %c0_20 = arith.constant 0 : index
    %25 = vector.load %arg8[%c0_19, %c0_20] : memref<128x1024xbf16, #tpu.memory_space<vmem>>, vector<128x1024xbf16>
    %cst_21 = arith.constant dense<0.000000e+00> : vector<8x1024xf32>
    %26 = tpu.matmul %24, %25, %cst_21 {dimension_numbers = #tpu.dot_dimension_numbers<[1], [0], [0], [1], [0, 0, 1, 1], [], []>} : vector<8x128xbf16>, vector<128x1024xbf16>, vector<8x1024xf32> -> vector<8x1024xf32>
    %c0_22 = arith.constant 0 : index
    %c0_23 = arith.constant 0 : index
    %27 = vector.load %arg9[%c0_22, %c0_23] : memref<1x1024xf32, #tpu.memory_space<vmem>>, vector<1x1024xf32>
    %28 = vector.broadcast %27 : vector<1x1024xf32> to vector<8x1024xf32>
    %29 = arith.addf %26, %28 : vector<8x1024xf32>
    %c0_24 = arith.constant 0 : index
    %c0_25 = arith.constant 0 : index
    %30 = vector.load %arg11[%c0_24, %c0_25] : memref<8x1024xf32, #tpu.memory_space<vmem>>, vector<8x1024xf32>
    tpu.vector_store %arg11[%c0_24, %c0_25], %29 {strides = array<i32>} : memref<8x1024xf32, #tpu.memory_space<vmem>>, vector<8x1024xf32>,
    return
  }
  func.func @transform_0(%arg0: i32) -> (i32, i32) {
    %c0_i32 = arith.constant 0 : i32
    %c0_i32_0 = arith.constant 0 : i32
    return %arg0, %c0_i32 : i32, i32
  }
  func.func @transform_1(%arg0: i32) -> (i32, i32) {
    %c0_i32 = arith.constant 0 : i32
    %c0_i32_0 = arith.constant 0 : i32
    %c0_i32_1 = arith.constant 0 : i32
    return %c0_i32, %c0_i32_0 : i32, i32
  }
  func.func @transform_2(%arg0: i32) -> (i32, i32) {
    %c0_i32 = arith.constant 0 : i32
    %c0_i32_0 = arith.constant 0 : i32
    %c0_i32_1 = arith.constant 0 : i32
    return %c0_i32, %c0_i32_0 : i32, i32
  }
  func.func @transform_3(%arg0: i32) -> (i32, i32) {
    %c0_i32 = arith.constant 0 : i32
    %c0_i32_0 = arith.constant 0 : i32
    %c0_i32_1 = arith.constant 0 : i32
    return %c0_i32, %c0_i32_0 : i32, i32
  }
  func.func @transform_4(%arg0: i32) -> (i32, i32) {
    %c0_i32 = arith.constant 0 : i32
    %c0_i32_0 = arith.constant 0 : i32
    %c0_i32_1 = arith.constant 0 : i32
    return %c0_i32, %c0_i32_0 : i32, i32
  }
  func.func @transform_5(%arg0: i32) -> (i32, i32) {
    %c0_i32 = arith.constant 0 : i32
    %c0_i32_0 = arith.constant 0 : i32
    %c0_i32_1 = arith.constant 0 : i32
    return %c0_i32, %c0_i32_0 : i32, i32
  }
  func.func @transform_6(%arg0: i32) -> (i32, i32) {
    %c0_i32 = arith.constant 0 : i32
    %c0_i32_0 = arith.constant 0 : i32
    %c0_i32_1 = arith.constant 0 : i32
    return %c0_i32, %c0_i32_0 : i32, i32
  }
  func.func @transform_7(%arg0: i32) -> (i32, i32) {
    %c0_i32 = arith.constant 0 : i32
    %c0_i32_0 = arith.constant 0 : i32
    %c0_i32_1 = arith.constant 0 : i32
    return %c0_i32, %c0_i32_0 : i32, i32
  }
  func.func @transform_8(%arg0: i32) -> (i32, i32) {
    %c0_i32 = arith.constant 0 : i32
    %c0_i32_0 = arith.constant 0 : i32
    %c0_i32_1 = arith.constant 0 : i32
    return %c0_i32, %c0_i32_0 : i32, i32
  }
  func.func @transform_9(%arg0: i32) -> (i32, i32) {
    %c0_i32 = arith.constant 0 : i32
    %c0_i32_0 = arith.constant 0 : i32
    return %arg0, %c0_i32 : i32, i32
  }
  func.func @transform_10(%arg0: i32) -> (i32, i32) {
    %c0_i32 = arith.constant 0 : i32
    %c0_i32_0 = arith.constant 0 : i32
    return %arg0, %c0_i32 : i32, i32
  }
}

</mosaic_0001>

<bundles_post_ra>
// kernel: tpu_custom_call.1
= control target key start
LH: loop header
LB: loop body
LE: loop exit
PB: predicated region body
PF: predicated region fallthrough
CT: control target
= control target key end

     0   :  { %16 = vsyncpa [#allocation3], 0  ;;  %s2386_s0 = inlined_call_operand.hbm [shape: f32[8,1024], index: 0, kind: input, shape index: {}]   ;;  %s2387_s1 = inlined_call_operand.hbm [shape: bf16[1024,128], index: 1, kind: input, shape index: {}]   ;;  %s2388_s2 = inlined_call_operand.vmem [shape: f32[1,128], index: 2, kind: input, shape index: {}]   ;;  %s2389_s3 = inlined_call_operand.hbm [shape: bf16[128,128], index: 3, kind: input, shape index: {}]   ;;  %s2390_s4 = inlined_call_operand.vmem [shape: f32[1,128], index: 4, kind: input, shape index: {}]   ;;  %s2391_s5 = inlined_call_operand.hbm [shape: bf16[128,128], index: 5, kind: input, shape index: {}]   ;;  %s2392_s6 = inlined_call_operand.vmem [shape: f32[1,128], index: 6, kind: input, shape index: {}]   ;;  %s2393_s7 = inlined_call_operand.hbm [shape: bf16[128,1024], index: 7, kind: input, shape index: {}]   ;;  %s2394_s8 = inlined_call_operand.vmem [shape: f32[1,1024], index: 8, kind: input, shape index: {}]   ;;  %s2395_s9 = inlined_call_operand.hbm [shape: f32[8,128], index: 9, kind: output, shape index: {0}]   ;;  %s2396_s10 = inlined_call_operand.hbm [shape: f32[8,1024], index: 10, kind: output, shape index: {1}]  }
   0x1   :  { %17 = vsyncpa [#allocation6], 0 }
   0x2   :  { %18 = vsyncpa [#allocation9], 0 }
   0x3   :  { %19 = vsyncpa [#allocation4], 0 }
   0x4   :  { %20 = vsyncpa [#allocation13], 0  ;;  %s2206_s13 = smov [#allocation5]   ;;  %s2042_s17 = scalar_lea.hbm %s2387_s1, 8192 }
   0x5   :  { %s36_s14 = sshll.u32 %s2206_s13, 4  ;;  %p2043_p0 = scmp.ne.s32.totalorder %s2387_s1, %s2042_s17  ;;  %s37_s14 = int_to_ptr.vmem [resolvable:$true] %s36_s14 }
   0x6   :  { %p2046_p1 = scmp.lt.u32.totalorder %s2042_s17, %s2387_s1 }
   0x8   :  { %p2048_p2 = pnand %p2046_p1, %p2043_p0 }
   0xa   :  { %2051 = shalt.err (!%p2048_p2)
}
   0xb   :  { %s2052_s22 = scalar_lea.vmem %s37_s14, 8192  ;;  %p2057_p4 = scmp.lt.s32.totalorder %s37_s14, %s37_s14 }
   0xc   :  { %p2053_p3 = scmp.ne.s32.totalorder %s37_s14, %s2052_s22  ;;  %p2058_p5 = scmp.lt.s32.totalorder %s2052_s22, %s2052_s22 }
   0xe   :  { %p2059_p6 = por %p2058_p5, %p2057_p4 }
  0x10   :  { %p2060_p7 = pnand %p2059_p6, %p2053_p3 }
  0x12   :  { %2063 = shalt.err (!%p2060_p7)
}
  0x13   :  { %s2207_s23 = smov 64   ;;  %s2208_s24 = smov 4  }
  0x14   :  { %42 = dma.hbm_to_vmem [thread:$0]  %s2387_s1, 8192, %s37_s14, [#allocation6], %s2207_s23, %s2207_s23, %s2208_s24  }
  0x15   :  { %s2209_s27 = smov [#allocation8]   ;;  %s2210_s29 = smov [#allocation2]  }
  0x16   :  { %s64_s28 = sshll.u32 %s2209_s27, 4  ;;  %s27_s30 = sshll.u32 %s2210_s29, 4  ;;  %s65_s28 = int_to_ptr.vmem [resolvable:$true] %s64_s28  ;;  %s28_s30 = int_to_ptr.vmem [resolvable:$true] %s27_s30 }
  0x17   :  { %s2064_s13 = scalar_lea.hbm %s2391_s5, 1024 }
  0x18   :  { %p2065_p8 = scmp.ne.s32.totalorder %s2391_s5, %s2064_s13  ;;  %p2068_p9 = scmp.lt.u32.totalorder %s2064_s13, %s2391_s5 }
  0x1a   :  { %p2070_p10 = pnand %p2068_p9, %p2065_p8 }
  0x1c   :  { %2073 = shalt.err (!%p2070_p10)
}
  0x1d   :  { %s2074_s1 = scalar_lea.vmem %s65_s28, 1024  ;;  %p2079_p12 = scmp.lt.s32.totalorder %s65_s28, %s65_s28 }
  0x1e   :  { %p2075_p11 = scmp.ne.s32.totalorder %s65_s28, %s2074_s1  ;;  %p2080_p13 = scmp.lt.s32.totalorder %s2074_s1, %s2074_s1 }
  0x20   :  { %p2081_p0 = por %p2080_p13, %p2079_p12 }
  0x22   :  { %p2082_p1 = pnand %p2081_p0, %p2075_p11 }
  0x24   :  { %2085 = shalt.err (!%p2082_p1)
}
  0x25   :  { %70 = dma.hbm_to_vmem [thread:$0]  %s2391_s5, 1024, %s65_s28, [#allocation9], %s2207_s23, %s2207_s23, %s2208_s24  }
  0x26   :  { %s2086_s22 = scalar_lea.hbm %s2386_s0, 1024 }
  0x27   :  { %p2087_p2 = scmp.ne.s32.totalorder %s2386_s0, %s2086_s22  ;;  %p2090_p3 = scmp.lt.u32.totalorder %s2086_s22, %s2386_s0 }
  0x29   :  { %p2092_p4 = pnand %p2090_p3, %p2087_p2 }
  0x2b   :  { %2095 = shalt.err (!%p2092_p4)
}
  0x2c   :  { %s2096_s11 = scalar_lea.vmem %s28_s30, 1024  ;;  %p2101_p6 = scmp.lt.s32.totalorder %s28_s30, %s28_s30 }
  0x2d   :  { %p2097_p5 = scmp.ne.s32.totalorder %s28_s30, %s2096_s11  ;;  %p2102_p7 = scmp.lt.s32.totalorder %s2096_s11, %s2096_s11 }
  0x2f   :  { %p2103_p8 = por %p2102_p7, %p2101_p6 }
  0x31   :  { %p2104_p9 = pnand %p2103_p8, %p2097_p5 }
  0x33   :  { %2107 = shalt.err (!%p2104_p9)
}
  0x34   :  { %30 = dma.hbm_to_vmem [thread:$0]  %s2386_s0, 1024, %s28_s30, [#allocation3]  }
  0x35   :  { %s2211_s12 = smov [#allocation7]   ;;  %s2212_s15 = smov [#allocation10]  }
  0x36   :  { %s50_s13 = sshll.u32 %s2211_s12, 4  ;;  %s78_s16 = sshll.u32 %s2212_s15, 4  ;;  %s51_s13 = int_to_ptr.vmem [resolvable:$true] %s50_s13  ;;  %s79_s16 = int_to_ptr.vmem [resolvable:$true] %s78_s16 }
  0x37   :  { %s2108_s1 = scalar_lea.hbm %s2389_s3, 1024 }
  0x38   :  { %p2109_p10 = scmp.ne.s32.totalorder %s2389_s3, %s2108_s1  ;;  %p2112_p11 = scmp.lt.u32.totalorder %s2108_s1, %s2389_s3 }
  0x3a   :  { %p2114_p12 = pnand %p2112_p11, %p2109_p10 }
  0x3c   :  { %2117 = shalt.err (!%p2114_p12)
}
  0x3d   :  { %s2118_s0 = scalar_lea.vmem %s51_s13, 1024  ;;  %p2123_p0 = scmp.lt.s32.totalorder %s51_s13, %s51_s13 }
  0x3e   :  { %p2119_p13 = scmp.ne.s32.totalorder %s51_s13, %s2118_s0  ;;  %p2124_p1 = scmp.lt.s32.totalorder %s2118_s0, %s2118_s0 }
  0x40   :  { %p2125_p2 = por %p2124_p1, %p2123_p0 }
  0x42   :  { %p2126_p3 = pnand %p2125_p2, %p2119_p13 }
  0x44   :  { %2129 = shalt.err (!%p2126_p3)
}
  0x45   :  { %56 = dma.hbm_to_vmem [thread:$0]  %s2389_s3, 1024, %s51_s13, [#allocation6], %s2207_s23, %s2207_s23, %s2208_s24  }
  0x46   :  { %s2130_s27 = scalar_lea.hbm %s2393_s7, 8192 }
  0x47   :  { %p2131_p4 = scmp.ne.s32.totalorder %s2393_s7, %s2130_s27  ;;  %p2134_p5 = scmp.lt.u32.totalorder %s2130_s27, %s2393_s7 }
  0x49   :  { %p2136_p6 = pnand %p2134_p5, %p2131_p4 }
  0x4b   :  { %2139 = shalt.err (!%p2136_p6)
}
  0x4c   :  { %s2140_s12 = scalar_lea.vmem %s79_s16, 8192  ;;  %p2145_p8 = scmp.lt.s32.totalorder %s79_s16, %s79_s16 }
  0x4d   :  { %p2141_p7 = scmp.ne.s32.totalorder %s79_s16, %s2140_s12  ;;  %p2146_p9 = scmp.lt.s32.totalorder %s2140_s12, %s2140_s12 }
  0x4f   :  { %p2147_p10 = por %p2146_p9, %p2145_p8 }
  0x51   :  { %p2148_p11 = pnand %p2147_p10, %p2141_p7 }
  0x53   :  { %2151 = shalt.err (!%p2148_p11)
}
  0x54   :  { %s2213_s3 = smov 512   ;;  %s2214_s23 = smov 32  }
  0x55   :  { %84 = dma.hbm_to_vmem [thread:$0]  %s2393_s7, 8192, %s79_s16, [#allocation9], %s2213_s3, %s2213_s3, %s2214_s23  }
  0x56   :  { %2196 = dma.done.wait [#allocation3], 1024  }
  0x57   :  { %2197 = vsyncadd [#allocation3], 4294966272 }
  0x58   :  { %2198 = dma.done.wait [#allocation6], 9216  }
  0x59   :  { %2199 = vsyncadd [#allocation6], 4294958080 }
  0x5a   :  { %2200 = dma.done.wait [#allocation9], 9216  }
  0x5b   :  { %2201 = vsyncadd [#allocation9], 4294958080  ;;  %v1962_v0 = vld [vmem:[#allocation5 + $0x40] sm:$0xff]   ;;  %v1966_v4 = vld [vmem:[#allocation5 + $0x48] sm:$0xff]   ;;  %vm2216_vm0 = vmmov 0  }
  0x5c   :  { %v1963_v1 = vld [vmem:[#allocation5 + $0xc0] sm:$0xff]   ;;  %1802 = vmatprep.subr.bf16.mxu0 %v1962_v0  ;;  %v1967_v5 = vld [vmem:[#allocation5 + $0xc8] sm:$0xff]   ;;  %v1970_v8 = vld [vmem:[#allocation5 + $0x50] sm:$0xff]  }
  0x5d   :  { %v1964_v2 = vld [vmem:[#allocation5] sm:$0xff]   ;;  %1824 = vmatprep.subr.bf16.mxu1 %v1963_v1  ;;  %v1968_v6 = vld [vmem:[#allocation5 + $0x8] sm:$0xff]   ;;  %v1971_v9 = vld [vmem:[#allocation5 + $0xd0] sm:$0xff]  }
  0x5e   :  { %v1965_v3 = vld [vmem:[#allocation5 + $0x80] sm:$0xff]   ;;  %1803 = vmatpush3.bf16.msra.mxu0 %v1964_v2  ;;  %v1969_v7 = vld [vmem:[#allocation5 + $0x88] sm:$0xff]   ;;  %v1972_v10 = vld [vmem:[#allocation5 + $0x10] sm:$0xff]  }
  0x5f   :  { %1825 = vmatpush3.bf16.msra.mxu1 %v1965_v3  ;;  %1804 = vmatprep.subr.bf16.mxu0 %v1966_v4  ;;  %v1973_v11 = vld [vmem:[#allocation5 + $0x90] sm:$0xff]   ;;  %v1974_v12 = vld [vmem:[#allocation5 + $0x58] sm:$0xff]   ;;  %v1978_v16 = vld [vmem:[#allocation5 + $0x60] sm:$0xff]  }
  0x60   :  { %1826 = vmatprep.subr.bf16.mxu1 %v1967_v5  ;;  %v1975_v13 = vld [vmem:[#allocation5 + $0xd8] sm:$0xff]   ;;  %v1979_v17 = vld [vmem:[#allocation5 + $0xe0] sm:$0xff]   ;;  %v1982_v20 = vld [vmem:[#allocation5 + $0x68] sm:$0xff]  }
  0x61   :  { %v1976_v14 = vld [vmem:[#allocation5 + $0x18] sm:$0xff]   ;;  %v1980_v18 = vld [vmem:[#allocation5 + $0x20] sm:$0xff]   ;;  %v1983_v21 = vld [vmem:[#allocation5 + $0xe8] sm:$0xff]  }
  0x62   :  { %1805 = vmatpush3.bf16.msra.mxu0 %v1968_v6  ;;  %v1977_v15 = vld [vmem:[#allocation5 + $0x98] sm:$0xff]   ;;  %v1981_v19 = vld [vmem:[#allocation5 + $0xa0] sm:$0xff]   ;;  %v1984_v22 = vld [vmem:[#allocation5 + $0x28] sm:$0xff]  }
  0x63   :  { %1827 = vmatpush3.bf16.msra.mxu1 %v1969_v7  ;;  %1806 = vmatprep.subr.bf16.mxu0 %v1970_v8  ;;  %v1985_v23 = vld [vmem:[#allocation5 + $0xa8] sm:$0xff]   ;;  %v1986_v24 = vld [vmem:[#allocation5 + $0x70] sm:$0xff]   ;;  %v1990_v28 = vld [vmem:[#allocation5 + $0x78] sm:$0xff]  }
  0x64   :  { %1828 = vmatprep.subr.bf16.mxu1 %v1971_v9  ;;  %v1987_v25 = vld [vmem:[#allocation5 + $0xf0] sm:$0xff]   ;;  %v1991_v29 = vld [vmem:[#allocation5 + $0xf8] sm:$0xff]   ;;  %v104_v32 = vld [vmem:[#allocation2 + $0x8] sm:$0xff] }
  0x65   :  { %v1988_v26 = vld [vmem:[#allocation5 + $0x30] sm:$0xff]   ;;  %v1992_v30 = vld [vmem:[#allocation5 + $0x38] sm:$0xff]   ;;  %v103_v34 = vld [vmem:[#allocation2] sm:$0xff]  ;;  %v112_v35 = vpack.c.bf16 %v104_v32, %v104_v32 }
  0x66   :  { %1807 = vmatpush3.bf16.msra.mxu0 %v1972_v10  ;;  %v1989_v27 = vld [vmem:[#allocation5 + $0xb0] sm:$0xff]   ;;  %v1993_v31 = vld [vmem:[#allocation5 + $0xb8] sm:$0xff]   ;;  %v111_v37 = vpack.c.bf16 %v103_v34, %v103_v34  ;;  %v1994_v40 = vld [vmem:[#allocation5 + $0x140] sm:$0xff]  }
  0x67   :  { %1829 = vmatpush3.bf16.msra.mxu1 %v1973_v11  ;;  %1808 = vmatprep.subr.bf16.mxu0 %v1974_v12  ;;  %v106_v33 = vld [vmem:[#allocation2 + $0x18] sm:$0xff]  ;;  %v105_v38 = vld [vmem:[#allocation2 + $0x10] sm:$0xff]  ;;  %v1995_v41 = vld [vmem:[#allocation5 + $0x1c0] sm:$0xff]  }
  0x68   :  { %1830 = vmatprep.subr.bf16.mxu1 %v1975_v13  ;;  %v114_v36 = vpack.c.bf16 %v106_v33, %v106_v33  ;;  %v113_v39 = vpack.c.bf16 %v105_v38, %v105_v38  ;;  %670 = vmatprep.mubr.bf16.mxu0 %v112_v35  ;;  %v1996_v42 = vld [vmem:[#allocation5 + $0x100] sm:$0xff]   ;;  %v1998_v44 = vld [vmem:[#allocation5 + $0x148] sm:$0xff]   ;;  %v2002_v48 = vld [vmem:[#allocation5 + $0x150] sm:$0xff]  }
  0x69   :  { %v1997_v43 = vld [vmem:[#allocation5 + $0x180] sm:$0xff]   ;;  %v1999_v45 = vld [vmem:[#allocation5 + $0x1c8] sm:$0xff]   ;;  %v2003_v49 = vld [vmem:[#allocation5 + $0x1d0] sm:$0xff]  }
  0x6a   :  { %1809 = vmatpush3.bf16.msra.mxu0 %v1976_v14  ;;  %710 = vmatprep.mubr.bf16.mxu1 %v114_v36  ;;  %v2000_v46 = vld [vmem:[#allocation5 + $0x108] sm:$0xff]   ;;  %v2004_v50 = vld [vmem:[#allocation5 + $0x110] sm:$0xff]   ;;  %v2006_v52 = vld [vmem:[#allocation5 + $0x158] sm:$0xff]  }
  0x6b   :  { %1831 = vmatpush3.bf16.msra.mxu1 %v1977_v15  ;;  %1810 = vmatprep.subr.bf16.mxu0 %v1978_v16  ;;  %v2001_v47 = vld [vmem:[#allocation5 + $0x188] sm:$0xff]   ;;  %v2005_v51 = vld [vmem:[#allocation5 + $0x190] sm:$0xff]   ;;  %v2007_v53 = vld [vmem:[#allocation5 + $0x1d8] sm:$0xff]  }
  0x6c   :  { %1832 = vmatprep.subr.bf16.mxu1 %v1979_v17  ;;  %v2008_v54 = vld [vmem:[#allocation5 + $0x118] sm:$0xff]   ;;  %v2010_v56 = vld [vmem:[#allocation5 + $0x160] sm:$0xff]   ;;  %v2014_v60 = vld [vmem:[#allocation5 + $0x168] sm:$0xff]   ;;  %v2215_v17 = vmov 0.0  }
  0x6d   :  { %v2009_v55 = vld [vmem:[#allocation5 + $0x198] sm:$0xff]   ;;  %v2011_v57 = vld [vmem:[#allocation5 + $0x1e0] sm:$0xff]   ;;  %v2015_v61 = vld [vmem:[#allocation5 + $0x1e8] sm:$0xff]  }
  0x6e   :  { %1811 = vmatpush3.bf16.msra.mxu0 %v1980_v18  ;;  %v2012_v58 = vld [vmem:[#allocation5 + $0x120] sm:$0xff]   ;;  %v2016_v62 = vld [vmem:[#allocation5 + $0x128] sm:$0xff]   ;;  %v2018_v0 = vld [vmem:[#allocation5 + $0x170] sm:$0xff]  }
  0x6f   :  { %1833 = vmatpush3.bf16.msra.mxu1 %v1981_v19  ;;  %1812 = vmatprep.subr.bf16.mxu0 %v1982_v20  ;;  %v2013_v59 = vld [vmem:[#allocation5 + $0x1a0] sm:$0xff]   ;;  %v2017_v63 = vld [vmem:[#allocation5 + $0x1a8] sm:$0xff]   ;;  %v2019_v1 = vld [vmem:[#allocation5 + $0x1f0] sm:$0xff]  }
  0x70   :  { %1834 = vmatprep.subr.bf16.mxu1 %v1983_v21  ;;  %v2020_v2 = vld [vmem:[#allocation5 + $0x130] sm:$0xff]   ;;  %v2022_v4 = vld [vmem:[#allocation5 + $0x178] sm:$0xff]   ;;  %v108_v8 = vld [vmem:[#allocation2 + $0x28] sm:$0xff] }
  0x71   :  { %v2021_v3 = vld [vmem:[#allocation5 + $0x1b0] sm:$0xff]   ;;  %v2023_v5 = vld [vmem:[#allocation5 + $0x1f8] sm:$0xff]   ;;  %v116_v10 = vpack.c.bf16 %v108_v8, %v108_v8  ;;  %v107_v12 = vld [vmem:[#allocation2 + $0x20] sm:$0xff] }
  0x72   :  { %1813 = vmatpush3.bf16.msra.mxu0 %v1984_v22  ;;  %v2024_v6 = vld [vmem:[#allocation5 + $0x138] sm:$0xff]   ;;  %v109_v13 = vld [vmem:[#allocation2 + $0x30] sm:$0xff]  ;;  %v115_v14 = vpack.c.bf16 %v107_v12, %v107_v12  ;;  %v2026_v16 = vld [vmem:[#allocation7] sm:$0xff]  }
  0x73   :  { %1835 = vmatpush3.bf16.msra.mxu1 %v1985_v23  ;;  %1814 = vmatprep.subr.bf16.mxu0 %v1986_v24  ;;  %v2025_v7 = vld [vmem:[#allocation5 + $0x1b8] sm:$0xff]   ;;  %v117_v15 = vpack.c.bf16 %v109_v13, %v109_v13  ;;  %v2027_v18 = vld [vmem:[#allocation7 + $0x8] sm:$0xff]   ;;  %v2028_v19 = vld [vmem:[#allocation7 + $0x10] sm:$0xff]  }
  0x74   :  { %1836 = vmatprep.subr.bf16.mxu1 %v1987_v25  ;;  %v110_v9 = vld [vmem:[#allocation2 + $0x38] sm:$0xff]  ;;  %v2030_v21 = vld [vmem:[#allocation7 + $0x20] sm:$0xff]   ;;  %v2031_v22 = vld [vmem:[#allocation7 + $0x28] sm:$0xff]  }
  0x75   :  { %v118_v11 = vpack.c.bf16 %v110_v9, %v110_v9  ;;  %v2029_v20 = vld [vmem:[#allocation7 + $0x18] sm:$0xff]   ;;  %v2032_v23 = vld [vmem:[#allocation7 + $0x30] sm:$0xff]   ;;  %v2034_v25 = vld [vmem:[#allocation8] sm:$0xff]  }
  0x76   :  { %1815 = vmatpush3.bf16.msra.mxu0 %v1988_v26  ;;  %v2033_v24 = vld [vmem:[#allocation7 + $0x38] sm:$0xff]   ;;  %v2035_v26 = vld [vmem:[#allocation8 + $0x8] sm:$0xff]   ;;  %v1655_v34 = vld [vmem:[%s2388_s2] ss:$0 sm:$0xff] }
  0x77   :  { %1837 = vmatpush3.bf16.msra.mxu1 %v1989_v27  ;;  %1816 = vmatprep.subr.bf16.mxu0 %v1990_v28  ;;  %v2036_v27 = vld [vmem:[#allocation8 + $0x10] sm:$0xff]   ;;  %v2037_v28 = vld [vmem:[#allocation8 + $0x18] sm:$0xff]   ;;  %v1042_v8 = vld [vmem:[#allocation10 + $0x80] sm:$0xff] }
  0x78   :  { %1838 = vmatprep.subr.bf16.mxu1 %v1991_v29  ;;  %v2038_v29 = vld [vmem:[#allocation8 + $0x20] sm:$0xff]  }
  0x79   :  { %v1046_v9 = vld [vmem:[#allocation10 + $0xa0] sm:$0xff] }
  0x7a   :  { %1817 = vmatpush3.bf16.msra.mxu0 %v1992_v30  ;;  %v2039_v30 = vld [vmem:[#allocation8 + $0x28] sm:$0xff]   ;;  %v1050_v12 = vld [vmem:[#allocation10 + $0xc0] sm:$0xff] }
  0x7b   :  { %1839 = vmatpush3.bf16.msra.mxu1 %v1993_v31  ;;  %1846 = vmatprep.subr.bf16.mxu0 %v1994_v40  ;;  %v2040_v31 = vld [vmem:[#allocation8 + $0x30] sm:$0xff]   ;;  %v1054_v13 = vld [vmem:[#allocation10 + $0xe0] sm:$0xff] }
  0x7c   :  { %1868 = vmatprep.subr.bf16.mxu1 %v1995_v41 }
  0x7d   :  { %671 = vmatmul.mubr.bf16.vlgmr.msra.gmra.mrb[0].mxu0 %v111_v37 }
  0x7e   :  { %711 = vmatmul.mubr.bf16.vlgmr.msra.gmra.mrb[0].mxu1 %v113_v39  ;;  %1847 = vmatpush3.bf16.msra.mxu0 %v1996_v42 }
  0x7f   :  { %1869 = vmatpush3.bf16.msra.mxu1 %v1997_v43  ;;  %1848 = vmatprep.subr.bf16.mxu0 %v1998_v44 }
  0x80   :  { %1870 = vmatprep.subr.bf16.mxu1 %v1999_v45  ;;  %750 = vmatprep.mubr.bf16.mxu0 %v116_v10  ;;  %v1755_v10 = vcombine.high %v1042_v8, %v1046_v9 }
  0x81   :  { %790 = vmatprep.mubr.bf16.mxu1 %v118_v11  ;;  %v1754_v11 = vcombine.low %v1042_v8, %v1046_v9  ;;  %v1033_v8 = vld [vmem:[#allocation10 + $0x38] sm:$0xff]  ;;  %v2217_v9 = vmov 0  }
  0x82   :  { %1849 = vmatpush3.bf16.msra.mxu0 %v2000_v46 }
  0x83   :  { %1871 = vmatpush3.bf16.msra.mxu1 %v2001_v47  ;;  %1850 = vmatprep.subr.bf16.mxu0 %v2002_v48 }
  0x84   :  { %1872 = vmatprep.subr.bf16.mxu1 %v2003_v49 }
  0x86   :  { %1851 = vmatpush3.bf16.msra.mxu0 %v2004_v50 }
  0x87   :  { %1873 = vmatpush3.bf16.msra.mxu1 %v2005_v51  ;;  %1852 = vmatprep.subr.bf16.mxu0 %v2006_v52 }
  0x88   :  { %1874 = vmatprep.subr.bf16.mxu1 %v2007_v53 }
  0x8a   :  { %1853 = vmatpush3.bf16.msra.mxu0 %v2008_v54 }
  0x8b   :  { %1875 = vmatpush3.bf16.msra.mxu1 %v2009_v55  ;;  %1854 = vmatprep.subr.bf16.mxu0 %v2010_v56 }
  0x8c   :  { %1876 = vmatprep.subr.bf16.mxu1 %v2011_v57 }
  0x8e   :  { %1855 = vmatpush3.bf16.msra.mxu0 %v2012_v58 }
  0x8f   :  { %1877 = vmatpush3.bf16.msra.mxu1 %v2013_v59  ;;  %1856 = vmatprep.subr.bf16.mxu0 %v2014_v60  ;;  %v2041_v59 = vld [vmem:[#allocation8 + $0x38] sm:$0xff]   ;;  %v1026_v60 = vld [vmem:[#allocation10] sm:$0xff] }
  0x90   :  { %1878 = vmatprep.subr.bf16.mxu1 %v2015_v61  ;;  %v1030_v61 = vld [vmem:[#allocation10 + $0x20] sm:$0xff] }
  0x92   :  { %1857 = vmatpush3.bf16.msra.mxu0 %v2016_v62  ;;  %v1027_v62 = vld [vmem:[#allocation10 + $0x8] sm:$0xff] }
  0x93   :  { %1879 = vmatpush3.bf16.msra.mxu1 %v2017_v63  ;;  %1858 = vmatprep.subr.bf16.mxu0 %v2018_v0  ;;  %v1738_v63 = vcombine.low %v1026_v60, %v1030_v61  ;;  %v1739_v0 = vcombine.high %v1026_v60, %v1030_v61  ;;  %v1086_v60 = vld [vmem:[#allocation10 + $0x1e0] sm:$0xff]  ;;  %v1083_v61 = vld [vmem:[#allocation10 + $0x1c8] sm:$0xff] }
  0x94   :  { %1880 = vmatprep.subr.bf16.mxu1 %v2019_v1  ;;  %v1031_v1 = vld [vmem:[#allocation10 + $0x28] sm:$0xff] }
  0x96   :  { %1859 = vmatpush3.bf16.msra.mxu0 %v2020_v2  ;;  %v1034_v2 = vld [vmem:[#allocation10 + $0x40] sm:$0xff] }
  0x97   :  { %1881 = vmatpush3.bf16.msra.mxu1 %v2021_v3  ;;  %1860 = vmatprep.subr.bf16.mxu0 %v2022_v4  ;;  %v1038_v3 = vld [vmem:[#allocation10 + $0x60] sm:$0xff]  ;;  %v1740_v4 = vcombine.low %v1027_v62, %v1031_v1 }
  0x98   :  { %1882 = vmatprep.subr.bf16.mxu1 %v2023_v5  ;;  %v1741_v5 = vcombine.high %v1027_v62, %v1031_v1 }
  0x9a   :  { %1861 = vmatpush3.bf16.msra.mxu0 %v2024_v6  ;;  %v1747_v6 = vcombine.high %v1034_v2, %v1038_v3 }
  0x9b   :  { %1883 = vmatpush3.bf16.msra.mxu1 %v2025_v7  ;;  %1908 = vmatprep.subr.bf16.mxu0 %v2215_v17  ;;  %v1746_v7 = vcombine.low %v1034_v2, %v1038_v3  ;;  %v1028_v3 = vld [vmem:[#allocation10 + $0x10] sm:$0xff] }
  0x9c   :  { %1928 = vmatprep.subr.bf16.mxu1 %v2215_v17 }
  0x9d   :  { %751 = vmatmul.mubr.bf16.vlgmr.msra.gmra.mrb[4].mxu0 %v115_v14  ;;  %v1763_v14 = vcombine.high %v1050_v12, %v1054_v13 }
  0x9e   :  { %791 = vmatmul.mubr.bf16.vlgmr.msra.gmra.mrb[4].mxu1 %v117_v15  ;;  %1909 = vmatpush3.bf16.msra.mxu0 %v2026_v16  ;;  %v1762_v15 = vcombine.low %v1050_v12, %v1054_v13  ;;  %v1058_v16 = vld [vmem:[#allocation10 + $0x100] sm:$0xff] }
  0x9f   :  { %1910 = vmatprep.subr.bf16.mxu0 %v2215_v17  ;;  %1924 = vmatprep.mubr.msk.bf16.mxu0 %vm2216_vm0, %v2215_v17  ;;  %v1729_v12 = vld [vmem:[%s2392_s6] ss:$0 sm:$0xff]  ;;  %s2218_s6 = smov [#allocation11]  }
  0xa0   :  { %1944 = vmatprep.mubr.msk.bf16.mxu1 %vm2216_vm0, %v2215_v17  ;;  %1929 = vmatpush3.bf16.msra.mxu1 %v2034_v25  ;;  %v1078_v25 = vld [vmem:[#allocation10 + $0x1a0] sm:$0xff]  ;;  %s1630_s18 = sshll.u32 %s2218_s6, 4  ;;  %s1631_s18 = int_to_ptr.vmem [resolvable:$true] %s1630_s18 }
  0xa1   :  { %1930 = vmatprep.subr.bf16.mxu1 %v2215_v17  ;;  %s2152_s1 = scalar_lea.vmem %s1631_s18, 128  ;;  %p2157_p13 = scmp.lt.s32.totalorder %s1631_s18, %s1631_s18 }
  0xa2   :  { %1911 = vmatpush3.bf16.msra.mxu0 %v2027_v18  ;;  %p2153_p12 = scmp.ne.s32.totalorder %s1631_s18, %s2152_s1  ;;  %p2158_p0 = scmp.lt.s32.totalorder %s2152_s1, %s2152_s1 }
  0xa3   :  { %1912 = vmatprep.subr.bf16.mxu0 %v2215_v17 }
  0xa4   :  { %1931 = vmatpush3.bf16.msra.mxu1 %v2035_v26  ;;  %p2159_p1 = por %p2158_p0, %p2157_p13 }
  0xa5   :  { %1932 = vmatprep.subr.bf16.mxu1 %v2215_v17 }
  0xa6   :  { %1913 = vmatpush3.bf16.msra.mxu0 %v2028_v19  ;;  %p2160_p2 = pnand %p2159_p1, %p2153_p12 }
  0xa7   :  { %1914 = vmatprep.subr.bf16.mxu0 %v2215_v17 }
  0xa8   :  { %1933 = vmatpush3.bf16.msra.mxu1 %v2036_v27 }
  0xa9   :  { %1934 = vmatprep.subr.bf16.mxu1 %v2215_v17 }
  0xaa   :  { %1915 = vmatpush3.bf16.msra.mxu0 %v2029_v20  ;;  %v1066_v20 = vld [vmem:[#allocation10 + $0x140] sm:$0xff] }
  0xab   :  { %1916 = vmatprep.subr.bf16.mxu0 %v2215_v17 }
  0xac   :  { %1935 = vmatpush3.bf16.msra.mxu1 %v2037_v28  ;;  %v1720_v28 = vld [vmem:[%s2390_s4] ss:$0 sm:$0xff] }
  0xad   :  { %1936 = vmatprep.subr.bf16.mxu1 %v2215_v17 }
  0xae   :  { %1917 = vmatpush3.bf16.msra.mxu0 %v2030_v21  ;;  %v1070_v21 = vld [vmem:[#allocation10 + $0x160] sm:$0xff] }
  0xaf   :  { %1918 = vmatprep.subr.bf16.mxu0 %v2215_v17 }
  0xb0   :  { %1937 = vmatpush3.bf16.msra.mxu1 %v2038_v29 }
  0xb1   :  { %1938 = vmatprep.subr.bf16.mxu1 %v2215_v17 }
  0xb2   :  { %1919 = vmatpush3.bf16.msra.mxu0 %v2031_v22  ;;  %v1779_v22 = vcombine.high %v1066_v20, %v1070_v21 }
  0xb3   :  { %1920 = vmatprep.subr.bf16.mxu0 %v2215_v17 }
  0xb4   :  { %1939 = vmatpush3.bf16.msra.mxu1 %v2039_v30  ;;  %v1035_v30 = vld [vmem:[#allocation10 + $0x48] sm:$0xff] }
  0xb5   :  { %1940 = vmatprep.subr.bf16.mxu1 %v2215_v17 }
  0xb6   :  { %1921 = vmatpush3.bf16.msra.mxu0 %v2032_v23  ;;  %v1778_v23 = vcombine.low %v1066_v20, %v1070_v21  ;;  %v1041_v20 = vld [vmem:[#allocation10 + $0x78] sm:$0xff] }
  0xb7   :  { %1922 = vmatprep.subr.bf16.mxu0 %v2215_v17 }
  0xb8   :  { %1941 = vmatpush3.bf16.msra.mxu1 %v2040_v31  ;;  %v1039_v31 = vld [vmem:[#allocation10 + $0x68] sm:$0xff] }
  0xb9   :  { %1942 = vmatprep.subr.bf16.mxu1 %v2215_v17  ;;  %v1062_v17 = vld [vmem:[#allocation10 + $0x120] sm:$0xff] }
  0xba   :  { %1923 = vmatpush3.bf16.msra.mxu0 %v2033_v24  ;;  %v1771_v18 = vcombine.high %v1058_v16, %v1062_v17  ;;  %v1770_v19 = vcombine.low %v1058_v16, %v1062_v17  ;;  %v1074_v24 = vld [vmem:[#allocation10 + $0x180] sm:$0xff]  ;;  %v1036_v16 = vld [vmem:[#allocation10 + $0x50] sm:$0xff] }
  0xbb   :  { %1452 = vmatprep.subr.bf16.mxu0 %v1739_v0  ;;  %v1787_v26 = vcombine.high %v1074_v24, %v1078_v25  ;;  %v1786_v27 = vcombine.low %v1074_v24, %v1078_v25 }
  0xbc   :  { %1943 = vmatpush3.bf16.msra.mxu1 %v2041_v59  ;;  %v1082_v59 = vld [vmem:[#allocation10 + $0x1c0] sm:$0xff] }
  0xbd   :  { %1493 = vmatprep.subr.bf16.mxu1 %v1741_v5  ;;  %v1795_v62 = vcombine.high %v1082_v59, %v1086_v60  ;;  %v1794_v0 = vcombine.low %v1082_v59, %v1086_v60  ;;  %v1029_v5 = vld [vmem:[#allocation10 + $0x18] sm:$0xff]  ;;  %v1080_v59 = vld [vmem:[#allocation10 + $0x1b0] sm:$0xff] }
  0xbe   :  { %v1077_v60 = vld [vmem:[#allocation10 + $0x198] sm:$0xff] }
 0x150   :  { %v1818_v32 = vpop.f32.mrb[0].mxu0 }
 0x151   :  { %v1840_v33 = vpop.f32.mrb[0].mxu1  ;;  %v1819_v35 = vpop.f32.mrb[1].mxu0 }
 0x152   :  { %v1841_v36 = vpop.f32.mrb[1].mxu1  ;;  %v1820_v37 = vadd.f32 %v1819_v35, %v1818_v32  ;;  %v1821_v39 = vpop.f32.mrb[2].mxu0 }
 0x153   :  { %v1842_v38 = vadd.f32 %v1841_v36, %v1840_v33  ;;  %v1843_v40 = vpop.f32.mrb[2].mxu1  ;;  %v1822_v41 = vpop.f32.mrb[3].mxu0  ;;  %v1047_v39 = vld [vmem:[#allocation10 + $0xa8] sm:$0xff] }
 0x154   :  { %v1844_v42 = vpop.f32.mrb[3].mxu1  ;;  %v673_v43 = vadd.f32 %v1820_v37, %v1655_v34  ;;  %v1749_v37 = vcombine.high %v1035_v30, %v1039_v31  ;;  %v1748_v40 = vcombine.low %v1035_v30, %v1039_v31 }
 0x155   :  { %v1051_v42 = vld [vmem:[#allocation10 + $0xc8] sm:$0xff] }
 0x156   :  { %v713_v44 = vadd.f32 %v1842_v38, %v673_v43  ;;  %v1043_v38 = vld [vmem:[#allocation10 + $0x88] sm:$0xff] }
 0x157   :  { %v1757_v41 = vcombine.high %v1043_v38, %v1047_v39  ;;  %v1055_v43 = vld [vmem:[#allocation10 + $0xe8] sm:$0xff] }
 0x170   :  { %v1862_v45 = vpop.f32.mrb[4].mxu0 }
 0x171   :  { %v1884_v46 = vpop.f32.mrb[4].mxu1  ;;  %v1863_v47 = vpop.f32.mrb[5].mxu0 }
 0x172   :  { %v1864_v48 = vadd.f32 %v1863_v47, %v1862_v45  ;;  %v1885_v49 = vpop.f32.mrb[5].mxu1  ;;  %v1865_v50 = vpop.f32.mrb[6].mxu0  ;;  %v1765_v45 = vcombine.high %v1051_v42, %v1055_v43  ;;  %v1063_v47 = vld [vmem:[#allocation10 + $0x128] sm:$0xff] }
 0x173   :  { %v1886_v51 = vadd.f32 %v1885_v49, %v1884_v46  ;;  %v1887_v52 = vpop.f32.mrb[6].mxu1  ;;  %v1866_v53 = vpop.f32.mrb[7].mxu0  ;;  %v1059_v46 = vld [vmem:[#allocation10 + $0x108] sm:$0xff] }
 0x174   :  { %v753_v54 = vadd.f32 %v1864_v48, %v713_v44  ;;  %v1888_v55 = vpop.f32.mrb[7].mxu1  ;;  %v1756_v44 = vcombine.low %v1043_v38, %v1047_v39  ;;  %v1764_v48 = vcombine.low %v1051_v42, %v1055_v43  ;;  %v1773_v49 = vcombine.high %v1059_v46, %v1063_v47  ;;  %v1067_v50 = vld [vmem:[#allocation10 + $0x148] sm:$0xff]  ;;  %v1060_v42 = vld [vmem:[#allocation10 + $0x110] sm:$0xff] }
 0x175   :  { %v1772_v52 = vcombine.low %v1059_v46, %v1063_v47  ;;  %v1079_v55 = vld [vmem:[#allocation10 + $0x1a8] sm:$0xff]  ;;  %v1064_v43 = vld [vmem:[#allocation10 + $0x130] sm:$0xff] }
 0x176   :  { %v793_v56 = vadd.f32 %v1886_v51, %v753_v54  ;;  %v1071_v51 = vld [vmem:[#allocation10 + $0x168] sm:$0xff] }
 0x177   :  { %v1781_v53 = vcombine.high %v1067_v50, %v1071_v51  ;;  %v1075_v54 = vld [vmem:[#allocation10 + $0x188] sm:$0xff] }
 0x178   :  { %v798_v57 = vmax.f32 %v793_v56, 0.0  ;;  %v1780_v56 = vcombine.low %v1067_v50, %v1071_v51  ;;  %v1068_v50 = vld [vmem:[#allocation10 + $0x150] sm:$0xff] }
 0x179   :  { %v1072_v51 = vld [vmem:[#allocation10 + $0x170] sm:$0xff] }
 0x17a   :  { %v799_v58 = vpack.c.bf16 %v798_v57, %v798_v57  ;;  %v1789_v57 = vcombine.high %v1075_v54, %v1079_v55 }
 0x17c   :  { %1925 = vmatmul.mubr.bf16.vlgmr.msra.gmra.mrb[8].mxu0 %v799_v58  ;;  %v1788_v58 = vcombine.low %v1075_v54, %v1079_v55  ;;  %v1774_v54 = vcombine.low %v1060_v42, %v1064_v43 }
 0x17d   :  { %1453 = vmatpush1.bf16.msra.mxu0 %v1738_v63  ;;  %v1087_v63 = vld [vmem:[#allocation10 + $0x1e8] sm:$0xff]  ;;  %1484 = vmatprep.mubr.bf16.mxu0 %v2217_v9 }
 0x17e   :  { %1454 = vmatprep.subr.bf16.mxu0 %v1747_v6  ;;  %v1796_v1 = vcombine.low %v1083_v61, %v1087_v63  ;;  %v1797_v2 = vcombine.high %v1083_v61, %v1087_v63  ;;  %v1081_v61 = vld [vmem:[#allocation10 + $0x1b8] sm:$0xff] }
 0x181   :  { %1455 = vmatpush1.bf16.msra.mxu0 %v1746_v7 }
 0x182   :  { %1456 = vmatprep.subr.bf16.mxu0 %v1755_v10  ;;  %v1744_v10 = vcombine.low %v1029_v5, %v1033_v8 }
 0x185   :  { %1457 = vmatpush1.bf16.msra.mxu0 %v1754_v11  ;;  %v1745_v11 = vcombine.high %v1029_v5, %v1033_v8  ;;  %v1089_v5 = vld [vmem:[#allocation10 + $0x1f8] sm:$0xff] }
 0x186   :  { %1458 = vmatprep.subr.bf16.mxu0 %v1763_v14 }
 0x189   :  { %1459 = vmatpush1.bf16.msra.mxu0 %v1762_v15 }
 0x18a   :  { %1460 = vmatprep.subr.bf16.mxu0 %v1771_v18  ;;  %v1040_v18 = vld [vmem:[#allocation10 + $0x70] sm:$0xff] }
 0x18b   :  { %v1751_v24 = vcombine.high %v1036_v16, %v1040_v18  ;;  %v1750_v30 = vcombine.low %v1036_v16, %v1040_v18 }
 0x18d   :  { %1461 = vmatpush1.bf16.msra.mxu0 %v1770_v19  ;;  %v1037_v19 = vld [vmem:[#allocation10 + $0x58] sm:$0xff] }
 0x18e   :  { %1462 = vmatprep.subr.bf16.mxu0 %v1779_v22  ;;  %v1753_v25 = vcombine.high %v1037_v19, %v1041_v20  ;;  %v1752_v31 = vcombine.low %v1037_v19, %v1041_v20 }
 0x191   :  { %1463 = vmatpush1.bf16.msra.mxu0 %v1778_v23 }
 0x192   :  { %1464 = vmatprep.subr.bf16.mxu0 %v1787_v26  ;;  %v1044_v26 = vld [vmem:[#allocation10 + $0x90] sm:$0xff] }
 0x195   :  { %1465 = vmatpush1.bf16.msra.mxu0 %v1786_v27  ;;  %v1048_v27 = vld [vmem:[#allocation10 + $0xb0] sm:$0xff] }
 0x196   :  { %1466 = vmatprep.subr.bf16.mxu0 %v1795_v62  ;;  %v1758_v38 = vcombine.low %v1044_v26, %v1048_v27  ;;  %v1782_v62 = vcombine.low %v1068_v50, %v1072_v51 }
 0x199   :  { %1467 = vmatpush1.bf16.msra.mxu0 %v1794_v0 }
 0x24f   :  { %v905_v29 = vpop.f32.mrb[8].mxu0 }
 0x250   :  { %v906_v32 = vadd.f32 %v1720_v28, %v905_v29  ;;  %v1926_v33 = vpop.f32.mrb[9].mxu0  ;;  %v1045_v28 = vld [vmem:[#allocation10 + $0x98] sm:$0xff] }
 0x251   :  { %v908_v34 = vpop.f32.mrb[10].mxu0  ;;  %v1049_v29 = vld [vmem:[#allocation10 + $0xb8] sm:$0xff] }
 0x252   :  { %v912_v35 = vpack.c.bf16 %v906_v32, %v906_v32  ;;  %911 = vst [vmem:[#allocation11] sm:$0xff] %v906_v32  ;;  %v1927_v36 = vpop.f32.mrb[11].mxu0  ;;  %v1759_v32 = vcombine.high %v1044_v26, %v1048_v27  ;;  %v1761_v33 = vcombine.high %v1045_v28, %v1049_v29  ;;  %v1052_v34 = vld [vmem:[#allocation10 + $0xd0] sm:$0xff]  ;;  %v1760_v39 = vcombine.low %v1045_v28, %v1049_v29 }
 0x253   :  { %v1053_v36 = vld [vmem:[#allocation10 + $0xd8] sm:$0xff] }
 0x254   :  { %1945 = vmatmul.mubr.bf16.vlgmr.msra.gmra.mrb[8].mxu1 %v912_v35  ;;  %v1056_v35 = vld [vmem:[#allocation10 + $0xf0] sm:$0xff] }
 0x255   :  { %1494 = vmatpush1.bf16.msra.mxu1 %v1740_v4  ;;  %v1032_v4 = vld [vmem:[#allocation10 + $0x30] sm:$0xff]  ;;  %1525 = vmatprep.mubr.bf16.mxu1 %v2217_v9  ;;  %v1766_v46 = vcombine.low %v1052_v34, %v1056_v35 }
 0x256   :  { %1495 = vmatprep.subr.bf16.mxu1 %v1749_v37  ;;  %v1742_v6 = vcombine.low %v1028_v3, %v1032_v4  ;;  %v1743_v7 = vcombine.high %v1028_v3, %v1032_v4  ;;  %v1057_v37 = vld [vmem:[#allocation10 + $0xf8] sm:$0xff]  ;;  %v1088_v3 = vld [vmem:[#allocation10 + $0x1f0] sm:$0xff] }
 0x257   :  { %v1768_v47 = vcombine.low %v1053_v36, %v1057_v37  ;;  %v1085_v4 = vld [vmem:[#allocation10 + $0x1d8] sm:$0xff] }
 0x258   :  { %1534 = vmatprep.subr.bf16.mxu0 %v1743_v7  ;;  %v1792_v7 = vcombine.low %v1077_v60, %v1081_v61 }
 0x259   :  { %1496 = vmatpush1.bf16.msra.mxu1 %v1748_v40  ;;  %v1767_v40 = vcombine.high %v1052_v34, %v1056_v35 }
 0x25a   :  { %1497 = vmatprep.subr.bf16.mxu1 %v1757_v41  ;;  %v1769_v41 = vcombine.high %v1053_v36, %v1057_v37 }
 0x25d   :  { %1498 = vmatpush1.bf16.msra.mxu1 %v1756_v44  ;;  %v1061_v44 = vld [vmem:[#allocation10 + $0x118] sm:$0xff] }
 0x25e   :  { %1499 = vmatprep.subr.bf16.mxu1 %v1765_v45  ;;  %v1065_v45 = vld [vmem:[#allocation10 + $0x138] sm:$0xff] }
 0x25f   :  { %v1776_v55 = vcombine.low %v1061_v44, %v1065_v45 }
 0x261   :  { %1500 = vmatpush1.bf16.msra.mxu1 %v1764_v48  ;;  %v1775_v48 = vcombine.high %v1060_v42, %v1064_v43 }
 0x262   :  { %1501 = vmatprep.subr.bf16.mxu1 %v1773_v49  ;;  %v1777_v49 = vcombine.high %v1061_v44, %v1065_v45 }
 0x265   :  { %1502 = vmatpush1.bf16.msra.mxu1 %v1772_v52  ;;  %v1069_v52 = vld [vmem:[#allocation10 + $0x158] sm:$0xff] }
 0x266   :  { %1503 = vmatprep.subr.bf16.mxu1 %v1781_v53  ;;  %v1073_v53 = vld [vmem:[#allocation10 + $0x178] sm:$0xff] }
 0x267   :  { %v1784_v63 = vcombine.low %v1069_v52, %v1073_v53 }
 0x269   :  { %1504 = vmatpush1.bf16.msra.mxu1 %v1780_v56  ;;  %v1783_v56 = vcombine.high %v1068_v50, %v1072_v51 }
 0x26a   :  { %1505 = vmatprep.subr.bf16.mxu1 %v1789_v57  ;;  %v1785_v57 = vcombine.high %v1069_v52, %v1073_v53 }
 0x26d   :  { %1506 = vmatpush1.bf16.msra.mxu1 %v1788_v58  ;;  %v1076_v58 = vld [vmem:[#allocation10 + $0x190] sm:$0xff] }
 0x26e   :  { %1507 = vmatprep.subr.bf16.mxu1 %v1797_v2  ;;  %v1791_v0 = vcombine.high %v1076_v58, %v1080_v59  ;;  %v1084_v2 = vld [vmem:[#allocation10 + $0x1d0] sm:$0xff] }
 0x26f   :  { %v1799_v8 = vcombine.high %v1084_v2, %v1088_v3 }
 0x271   :  { %1508 = vmatpush1.bf16.msra.mxu1 %v1796_v1  ;;  %v1793_v1 = vcombine.high %v1077_v60, %v1081_v61 }
 0x272   :  { %1575 = vmatprep.subr.bf16.mxu1 %v1745_v11  ;;  %v1800_v11 = vcombine.low %v1085_v4, %v1089_v5 }
 0x327   :  { %v1018_v13 = vpop.f32.mrb[8].mxu1 }
 0x328   :  { %v1019_v14 = vadd.f32 %v1729_v12, %v1018_v13  ;;  %v1946_v15 = vpop.f32.mrb[9].mxu1 }
 0x329   :  { %v1021_v17 = vpop.f32.mrb[10].mxu1 }
 0x32a   :  { %v1024_v21 = vmax.f32 %v1019_v14, 0.0  ;;  %v1947_v22 = vpop.f32.mrb[11].mxu1 }
 0x32c   :  { %v2353_v23 = vpack.c.bf16 %v1024_v21, %v1024_v21 }
 0x32e   :  { %1485 = vmatmul.mubr.bf16.vlgmr.msra.gmra.mrb[12].mxu0 %v2353_v23  ;;  %1526 = vmatmul.mubr.bf16.vlgmr.msra.gmra.mrb[12].mxu1 %v2353_v23 }
 0x32f   :  { %1535 = vmatpush1.bf16.msra.mxu0 %v1742_v6  ;;  %1576 = vmatpush1.bf16.msra.mxu1 %v1744_v10  ;;  %v1790_v6 = vcombine.low %v1076_v58, %v1080_v59  ;;  %v1798_v10 = vcombine.low %v1084_v2, %v1088_v3 }
 0x330   :  { %1536 = vmatprep.subr.bf16.mxu0 %v1751_v24  ;;  %1577 = vmatprep.subr.bf16.mxu1 %v1753_v25 }
 0x331   :  { %1566 = vmatprep.mubr.bf16.mxu0 %v2217_v9  ;;  %1607 = vmatprep.mubr.bf16.mxu1 %v2217_v9  ;;  %v1801_v9 = vcombine.high %v1085_v4, %v1089_v5 }
 0x333   :  { %1537 = vmatpush1.bf16.msra.mxu0 %v1750_v30  ;;  %1578 = vmatpush1.bf16.msra.mxu1 %v1752_v31 }
 0x334   :  { %1538 = vmatprep.subr.bf16.mxu0 %v1759_v32  ;;  %1579 = vmatprep.subr.bf16.mxu1 %v1761_v33 }
 0x337   :  { %1539 = vmatpush1.bf16.msra.mxu0 %v1758_v38  ;;  %1580 = vmatpush1.bf16.msra.mxu1 %v1760_v39 }
 0x338   :  { %1540 = vmatprep.subr.bf16.mxu0 %v1767_v40  ;;  %1581 = vmatprep.subr.bf16.mxu1 %v1769_v41 }
 0x33b   :  { %1541 = vmatpush1.bf16.msra.mxu0 %v1766_v46  ;;  %1582 = vmatpush1.bf16.msra.mxu1 %v1768_v47 }
 0x33c   :  { %1542 = vmatprep.subr.bf16.mxu0 %v1775_v48  ;;  %1583 = vmatprep.subr.bf16.mxu1 %v1777_v49 }
 0x33f   :  { %1543 = vmatpush1.bf16.msra.mxu0 %v1774_v54  ;;  %1584 = vmatpush1.bf16.msra.mxu1 %v1776_v55 }
 0x340   :  { %1544 = vmatprep.subr.bf16.mxu0 %v1783_v56  ;;  %1585 = vmatprep.subr.bf16.mxu1 %v1785_v57 }
 0x343   :  { %1545 = vmatpush1.bf16.msra.mxu0 %v1782_v62  ;;  %1586 = vmatpush1.bf16.msra.mxu1 %v1784_v63 }
 0x344   :  { %1546 = vmatprep.subr.bf16.mxu0 %v1791_v0  ;;  %1587 = vmatprep.subr.bf16.mxu1 %v1793_v1 }
 0x347   :  { %1547 = vmatpush1.bf16.msra.mxu0 %v1790_v6  ;;  %1588 = vmatpush1.bf16.msra.mxu1 %v1792_v7 }
 0x348   :  { %1548 = vmatprep.subr.bf16.mxu0 %v1799_v8  ;;  %1589 = vmatprep.subr.bf16.mxu1 %v1801_v9 }
 0x34b   :  { %1549 = vmatpush1.bf16.msra.mxu0 %v1798_v10  ;;  %1590 = vmatpush1.bf16.msra.mxu1 %v1800_v11 }
 0x34e   :  { %1567 = vmatmul.mubr.bf16.vlgmr.msra.gmra.mrb[16].mxu0 %v2353_v23  ;;  %1608 = vmatmul.mubr.bf16.vlgmr.msra.gmra.mrb[16].mxu1 %v2353_v23 }
 0x34f   :  { %2163 = shalt.err (!%p2160_p2)
}
 0x350   :  { %s2164_s20 = scalar_lea.hbm %s2395_s9, 128 }
 0x351   :  { %p2165_p3 = scmp.ne.s32.totalorder %s2395_s9, %s2164_s20  ;;  %p2168_p4 = scmp.lt.u32.totalorder %s2164_s20, %s2395_s9 }
 0x353   :  { %p2170_p5 = pnand %p2168_p4, %p2165_p3 }
 0x355   :  { %2173 = shalt.err (!%p2170_p5)
}
 0x356   :  { %1633 = dma.vmem_to_hbm [thread:$0]  %s1631_s18, 128, %s2395_s9, [#allocation4]   ;;  %v1092_v12 = vlaneseq  ;;  %v1090_v16 = vld [vmem:[%s2394_s8] sm:$0xff] }
 0x357   :  { %s2219_s8 = smov [#allocation12]  }
 0x358   :  { %v1093_v13 = vshrl.u32 %v1092_v12, 7  ;;  %s1640_s9 = sshll.u32 %s2219_s8, 4  ;;  %s1641_s9 = int_to_ptr.vmem [resolvable:$true] %s1640_s9 }
 0x359   :  { %s2174_s11 = scalar_lea.vmem %s1641_s9, 1024  ;;  %p2179_p7 = scmp.lt.s32.totalorder %s1641_s9, %s1641_s9 }
 0x35a   :  { %v1094_v14 = vsub.s32 0, %v1093_v13  ;;  %v1102_v15 = vsub.s32 2, %v1093_v13  ;;  %v1098_v17 = vsub.s32 1, %v1093_v13  ;;  %v1106_v18 = vsub.s32 3, %v1093_v13  ;;  %p2175_p6 = scmp.ne.s32.totalorder %s1641_s9, %s2174_s11  ;;  %p2180_p8 = scmp.lt.s32.totalorder %s2174_s11, %s2174_s11 }
 0x35b   :  { %v1110_v35 = vsub.s32 4, %v1093_v13  ;;  %v1118_v36 = vsub.s32 6, %v1093_v13  ;;  %v1114_v37 = vsub.s32 5, %v1093_v13  ;;  %v1122_v38 = vsub.s32 7, %v1093_v13 }
 0x35c   :  { %v1095_v19 = vrot.slane %v1090_v16, %v1094_v14  ;;  %v1103_v20 = vrot.slane %v1090_v16, %v1102_v15  ;;  %v1099_v21 = vrot.slane %v1090_v16, %v1098_v17  ;;  %v1107_v22 = vrot.slane %v1090_v16, %v1106_v18  ;;  %p2181_p9 = por %p2180_p8, %p2179_p7 }
 0x35d   :  { %v1111_v39 = vrot.slane %v1090_v16, %v1110_v35  ;;  %v1119_v40 = vrot.slane %v1090_v16, %v1118_v36  ;;  %v1115_v41 = vrot.slane %v1090_v16, %v1114_v37  ;;  %v1123_v42 = vrot.slane %v1090_v16, %v1122_v38 }
 0x35e   :  { %p2182_p10 = pnand %p2181_p9, %p2175_p6 }
 0x401   :  { %v1486_v23 = vpop.f32.mrb[12].mxu0  ;;  %v1527_v24 = vpop.f32.mrb[12].mxu1 }
 0x402   :  { %v1487_v25 = vadd.f32 %v1486_v23, %v1095_v19  ;;  %v1528_v26 = vadd.f32 %v1527_v24, %v1103_v20  ;;  %v1488_v27 = vpop.f32.mrb[13].mxu0  ;;  %v1529_v28 = vpop.f32.mrb[13].mxu1 }
 0x403   :  { %v1489_v29 = vadd.f32 %v1488_v27, %v1099_v21  ;;  %v1530_v30 = vadd.f32 %v1529_v28, %v1107_v22  ;;  %v1490_v31 = vpop.f32.mrb[14].mxu0  ;;  %v1531_v32 = vpop.f32.mrb[14].mxu1 }
 0x404   :  { %1616 = vst [vmem:[#allocation12] sm:$0xff] %v1487_v25  ;;  %1618 = vst [vmem:[#allocation12 + $0x10] sm:$0xff] %v1528_v26  ;;  %v1491_v33 = vpop.f32.mrb[15].mxu0  ;;  %v1532_v34 = vpop.f32.mrb[15].mxu1 }
 0x405   :  { %1617 = vst [vmem:[#allocation12 + $0x8] sm:$0xff] %v1489_v29  ;;  %1619 = vst [vmem:[#allocation12 + $0x18] sm:$0xff] %v1530_v30 }
 0x421   :  { %v1568_v43 = vpop.f32.mrb[16].mxu0  ;;  %v1609_v44 = vpop.f32.mrb[16].mxu1 }
 0x422   :  { %v1569_v45 = vadd.f32 %v1568_v43, %v1111_v39  ;;  %v1610_v46 = vadd.f32 %v1609_v44, %v1119_v40  ;;  %v1570_v47 = vpop.f32.mrb[17].mxu0  ;;  %v1611_v48 = vpop.f32.mrb[17].mxu1 }
 0x423   :  { %v1571_v49 = vadd.f32 %v1570_v47, %v1115_v41  ;;  %v1612_v50 = vadd.f32 %v1611_v48, %v1123_v42  ;;  %v1572_v51 = vpop.f32.mrb[18].mxu0  ;;  %v1613_v52 = vpop.f32.mrb[18].mxu1 }
 0x424   :  { %1620 = vst [vmem:[#allocation12 + $0x20] sm:$0xff] %v1569_v45  ;;  %1622 = vst [vmem:[#allocation12 + $0x30] sm:$0xff] %v1610_v46  ;;  %v1573_v53 = vpop.f32.mrb[19].mxu0  ;;  %v1614_v54 = vpop.f32.mrb[19].mxu1 }
 0x425   :  { %1621 = vst [vmem:[#allocation12 + $0x28] sm:$0xff] %v1571_v49  ;;  %1623 = vst [vmem:[#allocation12 + $0x38] sm:$0xff] %v1612_v50 }
 0x426   :  { %2185 = shalt.err (!%p2182_p10)
}
 0x427   :  { %s2186_s12 = scalar_lea.hbm %s2396_s10, 1024 }
 0x428   :  { %p2187_p11 = scmp.ne.s32.totalorder %s2396_s10, %s2186_s12  ;;  %p2190_p12 = scmp.lt.u32.totalorder %s2186_s12, %s2396_s10 }
 0x42a   :  { %p2192_p13 = pnand %p2190_p12, %p2187_p11 }
 0x42c   :  { %2195 = shalt.err (!%p2192_p13)
}
 0x42d   :  { %1643 = dma.vmem_to_hbm [thread:$0]  %s1641_s9, 1024, %s2396_s10, [#allocation13]  }
 0x42e   :  { %2202 = dma.done.wait [#allocation4], 128  }
 0x42f   :  { %2203 = vsyncadd [#allocation4], 4294967168 }
 0x430   :  { %2204 = dma.done.wait [#allocation13], 1024  }
 0x431   :  { %2205 = vsyncadd [#allocation13], 4294966272 }
 0x432   :  { %1650 = vsyncpa [#allocation3], 1 }
 0x433   :  { %1651 = vsyncpa [#allocation6], 1 }
 0x434   :  { %1652 = vsyncpa [#allocation9], 1 }
 0x435   :  { %1653 = vsyncpa [#allocation4], 1 }
 0x436   :  { %1654 = vsyncpa [#allocation13], 1 }

</bundles_post_ra>
